<compile_context>
chip_gen: v7x
topology: tpu7x:2x2x1
jax: 0.10.0
libtpu: 0.0.40
codegen_flags: <defaults>
</compile_context>

<pallas_src>
import math
import functools

import jax
import jax.numpy as jnp
from jax.experimental import pallas as pl
from jax.experimental.pallas import tpu as pltpu


def _pe_add_kernel(x_ref, pe_ref, o_ref, *, batch):
    # x_ref / o_ref: (block_s, B*D)   pe_ref: (block_s, D)
    pe = pe_ref[...]
    if batch > 1:
        # Tile pe along the lane axis so row s becomes [pe_s, pe_s, ..., pe_s]
        # matching the flattened (b, d) order of x.reshape(S, B*D).
        pe = jnp.concatenate([pe] * batch, axis=1)
    o_ref[...] = x_ref[...] + pe


def make_positional_encoding(dim_model, max_len=5000, dtype=jnp.float32):
    """Sinusoidal table (max_len, dim_model), matching the PyTorch init."""
    position = jnp.arange(0, max_len, dtype=jnp.float32)[:, None]           # (L, 1)
    div_term = jnp.exp(
        jnp.arange(0, dim_model, 2, dtype=jnp.float32)
        * (-math.log(10000.0) / dim_model)
    )                                                                        # (D/2,)
    angles = position * div_term                                             # (L, D/2)
    pe = jnp.zeros((max_len, dim_model), dtype=jnp.float32)
    pe = pe.at[:, 0::2].set(jnp.sin(angles))
    pe = pe.at[:, 1::2].set(jnp.cos(angles))
    return pe.astype(dtype)


def _choose_block_s(S, B, D, itemsize, target_block_bytes):
    """Sequence rows per block: ~target bytes of x per block, 8-row aligned."""
    rows = target_block_bytes // max(1, B * D * itemsize)
    rows = max(8, (rows // 8) * 8)
    if rows >= S:
        return S            # single block; equals full dim so always legal
    return rows             # multiple of 8, < S


@functools.partial(jax.jit, static_argnames=("block_s", "donate_x"))
def positional_encoding_forward(x, pe, block_s=None, donate_x=False):
    """x: (S, B, D); pe: (max_len, D). Returns x + pe[:S] broadcast over batch.

    Dropout p=0 in the module => identity at inference.
    """
    S, B, D = x.shape
    max_len, d_pe = pe.shape
    assert d_pe == D, "pe dim_model mismatch"
    assert S <= max_len, "sequence length exceeds positional-encoding table"
    if pe.dtype != x.dtype:
        pe = pe.astype(x.dtype)

    itemsize = jnp.dtype(x.dtype).itemsize
    if block_s is None:
        block_s = _choose_block_s(S, B, D, itemsize, 6 * 1024 * 1024)

    # Keep the full table (no wrapper-side slice) when the block is 8-aligned;
    # only slice when block_s == S and S is not a multiple of 8 (tiny-S corner
    # case, needed so the pe block equals its full leading dim).
    pe_in = pe if (block_s % 8 == 0) else pe[:S]

    # Free contiguous reshape -> lane-dense 2-D slab for unmasked full-vreg stores.
    x2 = x.reshape(S, B * D)

    # Explicit scoped-VMEM budget: double-buffered (x block + out block + pe block),
    # capped at 48 MiB so it also fits v7x's 64 MiB physical VMEM.
    x_block_bytes = block_s * B * D * itemsize
    pe_block_bytes = block_s * D * itemsize
    needed = 2 * (2 * x_block_bytes + pe_block_bytes)
    vmem_limit = int(min(48 * 1024 * 1024,
                         max(16 * 1024 * 1024, needed + (2 << 20))))

    grid = (pl.cdiv(S, block_s),)
    out2 = pl.pallas_call(
        functools.partial(_pe_add_kernel, batch=B),
        out_shape=jax.ShapeDtypeStruct((S, B * D), x.dtype),
        grid_spec=pltpu.PrefetchScalarGridSpec(
            num_scalar_prefetch=0,
            grid=grid,
            in_specs=[
                pl.BlockSpec((block_s, B * D), lambda i: (i, 0)),
                pl.BlockSpec((block_s, D), lambda i: (i, 0)),
            ],
            out_specs=pl.BlockSpec((block_s, B * D), lambda i: (i, 0)),
        ),
        compiler_params=pltpu.CompilerParams(
            dimension_semantics=("parallel",),
            vmem_limit_bytes=vmem_limit,
        ),
        input_output_aliases=({0: 0} if donate_x else {}),
    )(x2, pe_in)
    return out2.reshape(S, B, D)


if __name__ == "__main__":
    # Small shapes consistent with the module: seq=8, batch=2, dim_model=32.
    S, B, D = 8, 2, 32
    max_len = 64  # keep the table small; module default is 5000

    key = jax.random.PRNGKey(0)
    x = jax.random.normal(key, (S, B, D), dtype=jnp.float32)
    pe = make_positional_encoding(D, max_len=max_len)

    out = positional_encoding_forward(x, pe)
    out = jax.block_until_ready(out)

    # Reference in plain JAX (dropout p=0 => identity).
    ref = x + pe[:S, None, :]
    assert out.shape == (S, B, D)
    assert jnp.allclose(out, ref, atol=1e-6), "mismatch vs reference"

    print("KERNEL_OK")
</pallas_src>

<mosaic_0001>
module attributes {stable_mosaic.version = 11 : i64} {
  func.func @_pe_add_kernel(%arg0: i32, %arg1: memref<8x64xf32, #tpu.memory_space<vmem>>, %arg2: memref<8x32xf32, #tpu.memory_space<vmem>>, %arg3: memref<8x64xf32, #tpu.memory_space<vmem>>) attributes {dimension_semantics = [#tpu.dimension_semantics<parallel>], iteration_bounds = array<i64: 1>, scalar_prefetch = 0 : i64, scratch_operands = 0 : i64, tpu.core_type = #tpu.core_type<tc>, window_params = [{transform_indices = @transform_0, window_bounds = array<i64: 8, 64>}, {transform_indices = @transform_1, window_bounds = array<i64: 8, 32>}, {transform_indices = @transform_2, window_bounds = array<i64: 8, 64>}]} {
    %c0 = arith.constant 0 : index
    %c0_0 = arith.constant 0 : index
    %0 = vector.load %arg2[%c0, %c0_0] : memref<8x32xf32, #tpu.memory_space<vmem>>, vector<8x32xf32>
    %1 = tpu.concatenate %0, %0 in 1 : vector<8x32xf32>, vector<8x32xf32> -> vector<8x64xf32>
    %c0_1 = arith.constant 0 : index
    %c0_2 = arith.constant 0 : index
    %2 = vector.load %arg1[%c0_1, %c0_2] : memref<8x64xf32, #tpu.memory_space<vmem>>, vector<8x64xf32>
    %3 = arith.addf %2, %1 : vector<8x64xf32>
    %c0_3 = arith.constant 0 : index
    %c0_4 = arith.constant 0 : index
    %4 = vector.load %arg3[%c0_3, %c0_4] : memref<8x64xf32, #tpu.memory_space<vmem>>, vector<8x64xf32>
    tpu.vector_store %arg3[%c0_3, %c0_4], %3 {strides = array<i32>} : memref<8x64xf32, #tpu.memory_space<vmem>>, vector<8x64xf32>,
    return
  }
  func.func @transform_0(%arg0: i32) -> (i32, i32) {
    %c0_i32 = arith.constant 0 : i32
    %c0_i32_0 = arith.constant 0 : i32
    return %arg0, %c0_i32 : i32, i32
  }
  func.func @transform_1(%arg0: i32) -> (i32, i32) {
    %c0_i32 = arith.constant 0 : i32
    %c0_i32_0 = arith.constant 0 : i32
    return %arg0, %c0_i32 : i32, i32
  }
  func.func @transform_2(%arg0: i32) -> (i32, i32) {
    %c0_i32 = arith.constant 0 : i32
    %c0_i32_0 = arith.constant 0 : i32
    return %arg0, %c0_i32 : i32, i32
  }
}

</mosaic_0001>

<bundles_post_ra>
// kernel: positional_encoding_forward.1
= control target key start
LH: loop header
LB: loop body
LE: loop exit
PB: predicated region body
PF: predicated region fallthrough
CT: control target
= control target key end

     0   :  { %s27_s11 = smov 32   ;;  %vm16_vm0 = vcmask 261120   ;;  %vm20_vm1 = vcmask 523264   ;;  %s52_s1 = inlined_call_operand.vmem [shape: f32[64,32], index: 1, kind: input, shape index: {}]   ;;  %s53_s0 = inlined_call_operand.vmem [shape: f32[8,64], index: 0, kind: input, shape index: {}]   ;;  %s54_s2 = inlined_call_operand.vmem [shape: f32[8,64], index: 2, kind: output, shape index: {}]  }
   0x1   :  { %v11_v0 = vld [vmem:[%s52_s1] sm:$0xff] }
   0x2   :  { %13 = vrot.lane.b32.xlu0 %v11_v0, %s27_s11  ;;  %v18_v1 = vld [vmem:[%s53_s0] sm:$0xff] }
  0x74   :  { %v14_v2 = vpop.permute.xlu0 %13 }
  0x75   :  { %v17_v3 = vsel %vm16_vm0, %v11_v0, %v14_v2 }
  0x76   :  { %v19_v4 = vadd.f32 %v18_v1, %v17_v3 }
  0x78   :  { %21 = vst.msk [vmem:[%s54_s2] sm:$0xff] %vm20_vm1, %v19_v4 }

</bundles_post_ra>
